<compile_context>
chip_gen: v7x
topology: tpu7x:2x2x1
jax: 0.10.0
libtpu: 0.0.40
codegen_flags: <defaults>
</compile_context>

<pallas_src>
import functools

import numpy as np
import jax
import jax.numpy as jnp
from jax.experimental import pallas as pl
from jax.experimental.pallas import tpu as pltpu


# ------------------------------ helpers --------------------------------------

def _round_up(x, m):
    return ((x + m - 1) // m) * m


def _pick_tile(dim, pref, align):
    """Largest tile <= pref that is a multiple of `align` and divides `dim`;
    falls back to the full extent (always legal: full-extent blocks)."""
    if dim <= pref:
        return dim
    t = (pref // align) * align
    while t >= align:
        if dim % t == 0:
            return t
        t -= align
    return dim


# --------------------------- fused linear kernel ------------------------------
# y = [residual +] [quick_gelu(] (LN?(x)) @ W [+ b] [)]
#   grid (M//tm, N//tn, K//tk); bf16 MXU operands, f32 accumulation.
#   has_ln  -> K untiled (full-row stats), LN computed once per M tile.
#   nk == 1 -> no accumulator scratch, dot + epilogue written directly.

def _fused_linear_kernel(*refs, nk, activation, has_bias, has_residual, has_ln):
    it = iter(refs)
    x_ref = next(it)
    w_ref = next(it)
    b_ref = next(it) if has_bias else None
    r_ref = next(it) if has_residual else None
    if has_ln:
        g_ref = next(it)
        beta_ref = next(it)
    o_ref = next(it)
    acc_ref = next(it) if nk > 1 else None
    xn_ref = next(it) if has_ln else None

    if has_ln:
        # LayerNorm prologue: compute once per M tile (first N tile), cache the
        # normalized bf16 rows in VMEM and reuse them for the remaining N tiles.
        @pl.when(pl.program_id(1) == 0)
        def _():
            xf = x_ref[...].astype(jnp.float32)
            mean = jnp.mean(xf, axis=-1, keepdims=True)
            var = jnp.mean(jnp.square(xf - mean), axis=-1, keepdims=True)
            xf = (xf - mean) * jax.lax.rsqrt(var + 1e-5)
            xf = xf * g_ref[...].astype(jnp.float32) + beta_ref[...].astype(jnp.float32)
            xn_ref[...] = xf.astype(jnp.bfloat16)

        x_bf = xn_ref[...]
    else:
        x_bf = x_ref[...].astype(jnp.bfloat16)

    w_bf = w_ref[...].astype(jnp.bfloat16)

    def _epilogue(y):
        if has_bias:
            y = y + b_ref[...].astype(jnp.float32)
        if activation == "quick_gelu":
            y = y * jax.nn.sigmoid(1.702 * y)
        if has_residual:
            y = y + r_ref[...].astype(jnp.float32)
        return y.astype(o_ref.dtype)

    if nk == 1:
        # Single K step: skip the f32 accumulator round-trip.
        o_ref[...] = _epilogue(jnp.dot(x_bf, w_bf, preferred_element_type=jnp.float32))
    else:
        k_idx = pl.program_id(2)

        @pl.when(k_idx == 0)
        def _():
            acc_ref[...] = jnp.zeros_like(acc_ref)

        acc_ref[...] += jnp.dot(x_bf, w_bf, preferred_element_type=jnp.float32)

        @pl.when(k_idx == nk - 1)
        def _():
            o_ref[...] = _epilogue(acc_ref[...])


def fused_linear(x, w, *, bias=None, residual=None, ln=None, activation=None,
                 out_dtype=jnp.bfloat16, tm_pref=256, tn_pref=512, tk_pref=512):
    M, K = x.shape
    K2, N = w.shape
    assert K == K2

    tm = _pick_tile(M, tm_pref, 16)
    tn = _pick_tile(N, tn_pref, 128)
    tk = K if ln is not None else _pick_tile(K, tk_pref, 128)
    nm, nn, nk = M // tm, N // tn, K // tk

    in_specs = [pl.BlockSpec((tm, tk), lambda i, j, k: (i, k)),
                pl.BlockSpec((tk, tn), lambda i, j, k: (k, j))]
    args = [x, w]
    if bias is not None:
        in_specs.append(pl.BlockSpec((1, tn), lambda i, j, k: (0, j)))
        args.append(bias)
    if residual is not None:
        in_specs.append(pl.BlockSpec((tm, tn), lambda i, j, k: (i, j)))
        args.append(residual)
    if ln is not None:
        gamma, beta = ln
        in_specs += [pl.BlockSpec((1, tk), lambda i, j, k: (0, 0)),
                     pl.BlockSpec((1, tk), lambda i, j, k: (0, 0))]
        args += [gamma, beta]

    scratch = []
    if nk > 1:
        scratch.append(pltpu.VMEM((tm, tn), jnp.float32))
    if ln is not None:
        scratch.append(pltpu.VMEM((tm, K), jnp.bfloat16))

    # LN scratch carries state across N tiles of one row block, so keep N on a
    # single core ("arbitrary"); otherwise N is free to be megacore-sharded.
    dims = (("parallel", "arbitrary", "arbitrary") if ln is not None
            else ("parallel", "parallel", "arbitrary"))

    kernel = functools.partial(
        _fused_linear_kernel, nk=nk, activation=activation,
        has_bias=bias is not None, has_residual=residual is not None,
        has_ln=ln is not None)

    return pl.pallas_call(
        kernel,
        out_shape=jax.ShapeDtypeStruct((M, N), out_dtype),
        grid=(nm, nn, nk),
        in_specs=in_specs,
        out_specs=pl.BlockSpec((tm, tn), lambda i, j, k: (i, j)),
        scratch_shapes=scratch,
        compiler_params=pltpu.CompilerParams(dimension_semantics=dims),
    )(*args)


# ------------------------------ layernorm kernel ------------------------------
# Standalone LN only where its output must be materialized (pre-LN is
# hidden_states[0] / the residual stream). bf16 output, f32 statistics.

def _layernorm_kernel(x_ref, g_ref, b_ref, o_ref):
    x = x_ref[...].astype(jnp.float32)
    mean = jnp.mean(x, axis=-1, keepdims=True)
    var = jnp.mean(jnp.square(x - mean), axis=-1, keepdims=True)
    y = (x - mean) * jax.lax.rsqrt(var + 1e-5)
    o_ref[...] = (y * g_ref[...] + b_ref[...]).astype(o_ref.dtype)


def pallas_layernorm(x, gamma, beta, out_dtype=jnp.bfloat16, tm_pref=512):
    M, H = x.shape
    tm = _pick_tile(M, tm_pref, 16)
    return pl.pallas_call(
        _layernorm_kernel,
        out_shape=jax.ShapeDtypeStruct((M, H), out_dtype),
        grid=(M // tm,),
        in_specs=[pl.BlockSpec((tm, H), lambda i: (i, 0)),
                  pl.BlockSpec((1, H), lambda i: (0, 0)),
                  pl.BlockSpec((1, H), lambda i: (0, 0))],
        out_specs=pl.BlockSpec((tm, H), lambda i: (i, 0)),
        compiler_params=pltpu.CompilerParams(dimension_semantics=("parallel",)),
    )(x, gamma, beta)


# ------------------------------ attention kernel ------------------------------
# Grid (B, n_splits): one step per (batch, head-group). QKV is stored
# split-major ([Q_s|K_s|V_s] per split) so each step only streams its own
# lane-dense chunk; the softmax scale is already folded into the Q weights.
# Padded key rows (token padding) are masked. Heads are processed in pairs and
# stored directly into o_ref (wider, better-aligned stores; no big concatenate).

def _attn_kernel(qkv_ref, o_ref, *, heads_local, hd, s_valid):
    slab = qkv_ref[0]                       # (S_pad, 3*hid_local) bf16
    S = slab.shape[0]
    hid_l = heads_local * hd
    q = slab[:, :hid_l]
    k = slab[:, hid_l:2 * hid_l]
    v = slab[:, 2 * hid_l:]

    if s_valid < S:
        kidx = jax.lax.broadcasted_iota(jnp.int32, (1, S), 1)
        kmask = jnp.where(kidx < s_valid, 0.0, -1e30).astype(jnp.float32)
    else:
        kmask = None

    def head_out(h):
        sl = slice(h * hd, (h + 1) * hd)
        s = jax.lax.dot_general(q[:, sl], k[:, sl], (((1,), (1,)), ((), ())),
                                preferred_element_type=jnp.float32)
        if kmask is not None:
            s = s + kmask
        s = s - jnp.max(s, axis=-1, keepdims=True)
        p = jnp.exp(s)
        p = p * pl.reciprocal(jnp.sum(p, axis=-1, keepdims=True), approx=True)
        return jnp.dot(p.astype(jnp.bfloat16), v[:, sl],
                       preferred_element_type=jnp.float32)

    if heads_local % 2 == 0:
        for pair in range(heads_local // 2):
            h0, h1 = 2 * pair, 2 * pair + 1
            out2 = jnp.concatenate([head_out(h0), head_out(h1)], axis=-1)
            o_ref[0, :, h0 * hd:(h1 + 1) * hd] = out2.astype(o_ref.dtype)
    else:
        for h in range(heads_local):
            o_ref[0, :, h * hd:(h + 1) * hd] = head_out(h).astype(o_ref.dtype)


def pallas_attention(qkv, heads, n_splits, s_valid,
                     vmem_limit=48 * 1024 * 1024):
    B, S_pad, H3 = qkv.shape
    hid = H3 // 3
    heads_local = heads // n_splits
    hd = hid // heads
    hid_l = hid // n_splits
    return pl.pallas_call(
        functools.partial(_attn_kernel, heads_local=heads_local, hd=hd,
                          s_valid=s_valid),
        out_shape=jax.ShapeDtypeStruct((B, S_pad, hid), jnp.bfloat16),
        grid=(B, n_splits),
        in_specs=[pl.BlockSpec((1, S_pad, H3 // n_splits), lambda b, c: (b, 0, c))],
        out_specs=pl.BlockSpec((1, S_pad, hid_l), lambda b, c: (b, 0, c)),
        compiler_params=pltpu.CompilerParams(
            dimension_semantics=("parallel", "parallel"),
            vmem_limit_bytes=vmem_limit),
    )(qkv)


# ----------------------------- model parameters --------------------------------

def init_params(key, cfg):
    C, ps, hid, inter, layers, proj = (cfg["channels"], cfg["patch_size"],
                                       cfg["hidden"], cfg["intermediate"],
                                       cfg["num_layers"], cfg["proj_dim"])
    S = (cfg["image_size"] // ps) ** 2 + 1
    ks = iter(jax.random.split(key, 8 + 8 * layers))

    def w(shape, scale=0.02):
        return (scale * jax.random.normal(next(ks), shape)).astype(jnp.float32)

    params = {
        "patch_w": w((C * ps * ps, hid)),                 # conv as matmul (no bias)
        "class_emb": w((1, hid)),
        "pos_emb": w((S, hid)),
        "pre_ln_g": jnp.ones((1, hid), jnp.float32),
        "pre_ln_b": jnp.zeros((1, hid), jnp.float32),
        "post_ln_g": jnp.ones((1, hid), jnp.float32),
        "post_ln_b": jnp.zeros((1, hid), jnp.float32),
        "proj_w": w((hid, proj)),                         # visual_projection (no bias)
        "layers": [],
    }
    for _ in range(layers):
        params["layers"].append({
            "ln1_g": jnp.ones((1, hid), jnp.float32),
            "ln1_b": jnp.zeros((1, hid), jnp.float32),
            "qkv_w": w((hid, 3 * hid)),                   # fused Q|K|V
            "qkv_b": jnp.zeros((1, 3 * hid), jnp.float32),
            "o_w": w((hid, hid)),
            "o_b": jnp.zeros((1, hid), jnp.float32),
            "ln2_g": jnp.ones((1, hid), jnp.float32),
            "ln2_b": jnp.zeros((1, hid), jnp.float32),
            "fc1_w": w((hid, inter)),
            "fc1_b": jnp.zeros((1, inter), jnp.float32),
            "fc2_w": w((inter, hid)),
            "fc2_b": jnp.zeros((1, hid), jnp.float32),
        })
    return params


def num_attn_splits(cfg):
    # Split heads across two grid steps (v7x dual TensorCore) when both halves
    # of QKV / output stay 128-lane aligned; otherwise keep a single split.
    return 2 if (cfg["heads"] % 2 == 0 and cfg["hidden"] % 256 == 0) else 1


def prepare_params(params, cfg):
    """One-time weight prep: fold the softmax scale into the Q projection,
    reorder fused-QKV columns to split-major layout, pad the patch-embedding K
    dim to a multiple of 128, and cast all matmul weights to bf16."""
    hid, heads = cfg["hidden"], cfg["heads"]
    hd = hid // heads
    scale = float(hd) ** -0.5
    n_splits = num_attn_splits(cfg)

    prepped = dict(params)

    kpatch = params["patch_w"].shape[0]
    kpad = _round_up(kpatch, 128)
    patch_w = params["patch_w"]
    if kpad != kpatch:
        patch_w = jnp.pad(patch_w, ((0, kpad - kpatch), (0, 0)))
    prepped["patch_w"] = patch_w.astype(jnp.bfloat16)
    prepped["proj_w"] = params["proj_w"].astype(jnp.bfloat16)

    if n_splits > 1:
        hid_l = hid // n_splits
        cols = []
        for s in range(n_splits):
            cols.append(np.arange(s * hid_l, (s + 1) * hid_l))            # Q, split s
            cols.append(hid + np.arange(s * hid_l, (s + 1) * hid_l))      # K, split s
            cols.append(2 * hid + np.arange(s * hid_l, (s + 1) * hid_l))  # V, split s
        perm = np.concatenate(cols)
    else:
        perm = None

    layers = []
    for lp in params["layers"]:
        lp = dict(lp)
        qkv_w = lp["qkv_w"].at[:, :hid].multiply(scale)   # fold attn scale into Q
        qkv_b = lp["qkv_b"].at[:, :hid].multiply(scale)
        if perm is not None:
            qkv_w = qkv_w[:, perm]
            qkv_b = qkv_b[:, perm]
        lp["qkv_w"] = qkv_w.astype(jnp.bfloat16)
        lp["qkv_b"] = qkv_b
        lp["o_w"] = lp["o_w"].astype(jnp.bfloat16)
        lp["fc1_w"] = lp["fc1_w"].astype(jnp.bfloat16)
        lp["fc2_w"] = lp["fc2_w"].astype(jnp.bfloat16)
        layers.append(lp)
    prepped["layers"] = layers
    return prepped


# ------------------------------- forward pass ----------------------------------

def encoder_layer(h2d, p, B, S_pad, hid, heads, n_splits, s_valid):
    # LN1 fused into QKV prologue; bias fused into epilogue.
    qkv = fused_linear(h2d, p["qkv_w"], bias=p["qkv_b"],
                       ln=(p["ln1_g"], p["ln1_b"]))                       # (B*S_pad, 3*hid) bf16
    attn = pallas_attention(qkv.reshape(B, S_pad, 3 * hid), heads, n_splits, s_valid)
    # o_proj with bias + residual-add fused.
    h2d = fused_linear(attn.reshape(B * S_pad, hid), p["o_w"], bias=p["o_b"],
                       residual=h2d)
    # LN2 fused into FC1 prologue; quick_gelu fused into FC1 epilogue.
    x = fused_linear(h2d, p["fc1_w"], bias=p["fc1_b"],
                     ln=(p["ln2_g"], p["ln2_b"]), activation="quick_gelu")
    # FC2 with bias + residual-add fused.
    h2d = fused_linear(x, p["fc2_w"], bias=p["fc2_b"], residual=h2d)
    return h2d


def clip_vision_tower_forward(images, params, cfg):
    # images: (B, C, H, W) float32 (NCHW, matching PyTorch)
    B, C, H, W = images.shape
    ps = cfg["patch_size"]
    hid = cfg["hidden"]
    heads = cfg["heads"]
    num_layers = cfg["num_layers"]
    gh, gw = H // ps, W // ps
    P = gh * gw
    S = P + 1
    # Pad the token dim once so M = B*S_pad tiles cleanly (S=577 is prime for CLIP).
    S_pad = _round_up(S, 128) if S > 128 else _round_up(S, 16)
    n_splits = num_attn_splits(cfg)

    # --- patch embedding: conv(kernel=stride=ps, no bias) == patchify + matmul ---
    patches = images.astype(jnp.float32).reshape(B, C, gh, ps, gw, ps)
    patches = patches.transpose(0, 2, 4, 1, 3, 5).reshape(B * P, C * ps * ps)
    kpad = params["patch_w"].shape[0]
    if kpad != patches.shape[1]:
        patches = jnp.pad(patches, ((0, 0), (0, kpad - patches.shape[1])))
    patch_emb = fused_linear(patches, params["patch_w"]).reshape(B, P, hid)

    # --- cls token + position embeddings (glue), then pad tokens with zeros ---
    cls = jnp.broadcast_to(params["class_emb"][None], (B, 1, hid))
    x = jnp.concatenate([cls, patch_emb.astype(jnp.float32)], axis=1) + params["pos_emb"][None]
    if S_pad != S:
        x = jnp.pad(x, ((0, 0), (0, S_pad - S), (0, 0)))

    # --- pre layernorm (materialized: it is hidden_states[0] / the residual stream) ---
    x2d = pallas_layernorm(x.reshape(B * S_pad, hid),
                           params["pre_ln_g"], params["pre_ln_b"])

    # --- encoder; only retain the selected hidden state and the last one ---
    sel_idx = cfg["select_layer"] % (num_layers + 1)
    selected = x2d if sel_idx == 0 else None
    h2d = x2d
    for li, layer_params in enumerate(params["layers"], start=1):
        h2d = encoder_layer(h2d, layer_params, B, S_pad, hid, heads, n_splits, S)
        if li == sel_idx:
            selected = h2d

    # --- feature_select: hidden_states[select_layer][:, 1:]  ('patch') ---
    image_features = selected.reshape(B, S_pad, hid)[:, 1:S]

    # --- image_embeds: post_layernorm(CLS of last layer) @ visual_projection ---
    pooled = h2d.reshape(B, S_pad, hid)[:, 0]                  # (B, hid)
    clip_image_features = fused_linear(pooled, params["proj_w"],
                                       ln=(params["post_ln_g"], params["post_ln_b"]),
                                       out_dtype=jnp.float32)

    # match `.to(images.dtype)` casts
    return (clip_image_features.astype(images.dtype),
            image_features.astype(images.dtype))


# --------------------------------- main -----------------------------------------

if __name__ == "__main__":
    cfg = dict(
        image_size=16, patch_size=8, channels=3,
        hidden=32, heads=4, intermediate=64, num_layers=3,
        proj_dim=16, select_layer=-2,
    )
    key = jax.random.PRNGKey(0)
    k_img, k_params = jax.random.split(key)
    images = jax.random.normal(k_img, (2, cfg["channels"], cfg["image_size"],
                                       cfg["image_size"]), dtype=jnp.float32)
    params = prepare_params(init_params(k_params, cfg), cfg)

    clip_image_features, image_features = clip_vision_tower_forward(images, params, cfg)
    jax.block_until_ready((clip_image_features, image_features))

    assert clip_image_features.shape == (2, cfg["proj_dim"])
    assert image_features.shape == (2, (cfg["image_size"] // cfg["patch_size"]) ** 2,
                                    cfg["hidden"])
    assert bool(jnp.all(jnp.isfinite(clip_image_features)))
    assert bool(jnp.all(jnp.isfinite(image_features)))
    print("KERNEL_OK")
</pallas_src>

<mosaic_0001>
module attributes {stable_mosaic.version = 11 : i64} {
  func.func @_fused_linear_kernel(%arg0: i32, %arg1: i32, %arg2: i32, %arg3: memref<8x256xf32, #tpu.memory_space<vmem>>, %arg4: memref<256x32xbf16, #tpu.memory_space<vmem>>, %arg5: memref<8x32xbf16, #tpu.memory_space<vmem>>) attributes {dimension_semantics = [#tpu.dimension_semantics<parallel>, #tpu.dimension_semantics<parallel>, #tpu.dimension_semantics<arbitrary>], iteration_bounds = array<i64: 1, 1, 1>, scalar_prefetch = 0 : i64, scratch_operands = 0 : i64, tpu.core_type = #tpu.core_type<tc>, window_params = [{transform_indices = @transform_0, window_bounds = array<i64: 8, 256>}, {transform_indices = @transform_1, window_bounds = array<i64: 256, 32>}, {transform_indices = @transform_2, window_bounds = array<i64: 8, 32>}]} {
    %c0 = arith.constant 0 : index
    %c0_0 = arith.constant 0 : index
    %0 = vector.load %arg3[%c0, %c0_0] : memref<8x256xf32, #tpu.memory_space<vmem>>, vector<8x256xf32>
    %1 = arith.truncf %0 : vector<8x256xf32> to vector<8x256xbf16>
    %c0_1 = arith.constant 0 : index
    %c0_2 = arith.constant 0 : index
    %2 = vector.load %arg4[%c0_1, %c0_2] : memref<256x32xbf16, #tpu.memory_space<vmem>>, vector<256x32xbf16>
    %cst = arith.constant dense<0.000000e+00> : vector<8x32xf32>
    %3 = tpu.matmul %1, %2, %cst {dimension_numbers = #tpu.dot_dimension_numbers<[1], [0], [0], [1], [0, 0, 1, 1], [], []>} : vector<8x256xbf16>, vector<256x32xbf16>, vector<8x32xf32> -> vector<8x32xf32>
    %4 = arith.truncf %3 : vector<8x32xf32> to vector<8x32xbf16>
    %c0_3 = arith.constant 0 : index
    %c0_4 = arith.constant 0 : index
    %5 = vector.load %arg5[%c0_3, %c0_4] : memref<8x32xbf16, #tpu.memory_space<vmem>>, vector<8x32xbf16>
    tpu.vector_store %arg5[%c0_3, %c0_4], %4 {strides = array<i32>} : memref<8x32xbf16, #tpu.memory_space<vmem>>, vector<8x32xbf16>,
    return
  }
  func.func @transform_0(%arg0: i32, %arg1: i32, %arg2: i32) -> (i32, i32) {
    %c0_i32 = arith.constant 0 : i32
    return %arg0, %arg2 : i32, i32
  }
  func.func @transform_1(%arg0: i32, %arg1: i32, %arg2: i32) -> (i32, i32) {
    %c0_i32 = arith.constant 0 : i32
    return %arg2, %arg1 : i32, i32
  }
  func.func @transform_2(%arg0: i32, %arg1: i32, %arg2: i32) -> (i32, i32) {
    %c0_i32 = arith.constant 0 : i32
    return %arg0, %arg1 : i32, i32
  }
}

</mosaic_0001>

<bundles_post_ra>
// kernel: tpu_custom_call.1
= control target key start
LH: loop header
LB: loop body
LE: loop exit
PB: predicated region body
PF: predicated region fallthrough
CT: control target
= control target key end

     0   :  { %s363_s0 = inlined_call_operand.vmem [shape: f32[8,256], index: 0, kind: input, shape index: {}]   ;;  %s364_s1 = inlined_call_operand.vmem [shape: bf16[256,32], index: 1, kind: input, shape index: {}]   ;;  %s365_s2 = inlined_call_operand.hbm [shape: bf16[8,32], index: 2, kind: output, shape index: {}]  }
   0x1   :  { %v241_v0 = vld [vmem:[%s364_s1 + $0x40] sm:$0xff]   ;;  %v243_v2 = vld [vmem:[%s364_s1 + $0x48] sm:$0xff]   ;;  %v245_v4 = vld [vmem:[%s364_s1 + $0x50] sm:$0xff]  }
   0x2   :  { %v242_v1 = vld [vmem:[%s364_s1] sm:$0xff]   ;;  %218 = vmatprep.subr.bf16.mxu0 %v241_v0  ;;  %v244_v3 = vld [vmem:[%s364_s1 + $0x8] sm:$0xff]   ;;  %v246_v5 = vld [vmem:[%s364_s1 + $0x10] sm:$0xff]  }
   0x3   :  { %219 = vmatpush3.bf16.msra.mxu0 %v242_v1  ;;  %v247_v6 = vld [vmem:[%s364_s1 + $0x58] sm:$0xff]   ;;  %v249_v8 = vld [vmem:[%s364_s1 + $0x60] sm:$0xff]   ;;  %v251_v10 = vld [vmem:[%s364_s1 + $0x68] sm:$0xff]  }
   0x4   :  { %220 = vmatprep.subr.bf16.mxu0 %v243_v2  ;;  %v248_v7 = vld [vmem:[%s364_s1 + $0x18] sm:$0xff]   ;;  %v250_v9 = vld [vmem:[%s364_s1 + $0x20] sm:$0xff]   ;;  %v14_v11 = vld [vmem:[%s363_s0 + $0x8] sm:$0xff] }
   0x7   :  { %221 = vmatpush3.bf16.msra.mxu0 %v244_v3 }
   0x8   :  { %222 = vmatprep.subr.bf16.mxu0 %v245_v4 }
   0xb   :  { %223 = vmatpush3.bf16.msra.mxu0 %v246_v5 }
   0xc   :  { %224 = vmatprep.subr.bf16.mxu0 %v247_v6 }
   0xf   :  { %225 = vmatpush3.bf16.msra.mxu0 %v248_v7 }
  0x10   :  { %226 = vmatprep.subr.bf16.mxu0 %v249_v8 }
  0x11   :  { %7 = vsyncpa [#allocation3], 0  ;;  %v16_v12 = vpack.c.bf16 %v14_v11, %v14_v11  ;;  %v252_v13 = vld [vmem:[%s364_s1 + $0x28] sm:$0xff]   ;;  %v253_v14 = vld [vmem:[%s364_s1 + $0x70] sm:$0xff]   ;;  %s281_s17 = smov [#allocation2]   ;;  %vm186_vm0 = vcmask 257024  }
  0x12   :  { %v254_v15 = vld [vmem:[%s364_s1 + $0x30] sm:$0xff]   ;;  %v255_v16 = vld [vmem:[%s364_s1 + $0x78] sm:$0xff]   ;;  %v13_v18 = vld [vmem:[%s363_s0] sm:$0xff]  ;;  %s194_s18 = sshll.u32 %s281_s17, 4  ;;  %s195_s18 = int_to_ptr.vmem [resolvable:$true] %s194_s18 }
  0x13   :  { %227 = vmatpush3.bf16.msra.mxu0 %v250_v9  ;;  %177 = vmatprep.mubr.bf16.mxu0 %v16_v12  ;;  %v256_v17 = vld [vmem:[%s364_s1 + $0x38] sm:$0xff]   ;;  %v15_v19 = vpack.c.bf16 %v13_v18, %v13_v18  ;;  %s257_s1 = scalar_lea.vmem %s195_s18, 64  ;;  %p262_p1 = scmp.lt.s32.totalorder %s195_s18, %s195_s18 }
  0x14   :  { %228 = vmatprep.subr.bf16.mxu0 %v251_v10  ;;  %p258_p0 = scmp.ne.s32.totalorder %s195_s18, %s257_s1  ;;  %p263_p2 = scmp.lt.s32.totalorder %s257_s1, %s257_s1 }
  0x16   :  { %p264_p3 = por %p263_p2, %p262_p1 }
  0x17   :  { %229 = vmatpush3.bf16.msra.mxu0 %v252_v13 }
  0x18   :  { %230 = vmatprep.subr.bf16.mxu0 %v253_v14  ;;  %p265_p4 = pnand %p264_p3, %p258_p0 }
  0x1b   :  { %231 = vmatpush3.bf16.msra.mxu0 %v254_v15 }
  0x1c   :  { %232 = vmatprep.subr.bf16.mxu0 %v255_v16 }
  0x1f   :  { %233 = vmatpush3.bf16.msra.mxu0 %v256_v17 }
  0x22   :  { %178 = vmatmul.mubr.bf16.vlgmr.msra.gmra.mrb[0].mxu0 %v15_v19 }
  0xf5   :  { %v234_v20 = vpop.f32.mrb[0].mxu0 }
  0xf6   :  { %v235_v21 = vpop.f32.mrb[1].mxu0 }
  0xf7   :  { %v236_v22 = vadd.f32 %v235_v21, %v234_v20  ;;  %v237_v23 = vpop.f32.mrb[2].mxu0 }
  0xf8   :  { %v238_v24 = vpop.f32.mrb[3].mxu0 }
  0xf9   :  { %v185_v25 = vpack.c.bf16 %v236_v22, %v236_v22 }
  0xfb   :  { %187 = vst.msk [vmem:[#allocation2] sm:$0xf] %vm186_vm0, %v185_v25 }
  0xfc   :  { %268 = shalt.err (!%p265_p4)
}
  0xfd   :  { %s269_s20 = scalar_lea.hbm %s365_s2, 64 }
  0xfe   :  { %p270_p5 = scmp.ne.s32.totalorder %s365_s2, %s269_s20  ;;  %p273_p6 = scmp.lt.u32.totalorder %s269_s20, %s365_s2 }
 0x100   :  { %p275_p7 = pnand %p273_p6, %p270_p5 }
 0x102   :  { %278 = shalt.err (!%p275_p7)
}
 0x103   :  { %197 = dma.vmem_to_hbm [thread:$0]  %s195_s18, 64, %s365_s2, [#allocation3]  }
 0x104   :  { %279 = dma.done.wait [#allocation3], 64  }
 0x105   :  { %280 = vsyncadd [#allocation3], 4294967232 }
 0x106   :  { %201 = vsyncpa [#allocation3], 1 }

</bundles_post_ra>
